<compile_context>
chip_gen: v7x
topology: tpu7x:2x2x1
jax: 0.10.0
libtpu: 0.0.40
codegen_flags: <defaults>
</compile_context>

<pallas_src>
import functools

import jax
import jax.numpy as jnp
from jax.experimental import pallas as pl
from jax.experimental.pallas import tpu as pltpu

# Problem sizes (small, consistent with the module's forward)
B = 2               # batch
S = 16              # sequence length
D = 32              # input_dim (embedding)
KERNEL_SIZES = (2, 3, 4)
NUM_FILTERS = 16
OUTPUT_DIM = 8


def textcnn_kernel(kernel_sizes, num_filters, batch, seq, output_dim,
                   x_ref, w_ref, b_ref, out_ref):
    """Fused forward: im2col -> one conv matmul -> relu -> masked max+mean pool -> fc.

    x_ref  : (batch*seq, D)                    flattened input block
    w_ref  : (k_max*D, nF + OUT)               packed weights:
                                                 cols [0:nF]        = conv weights
                                                                      (zero rows for unused taps)
                                                 rows [0:nF] of cols [nF:nF+OUT] = fc weight^T
    b_ref  : (1, nF + OUT)                     packed biases: [conv_b | fc_b]
    out_ref: (batch, OUT)
    """
    k_max = max(kernel_sizes)
    n_feat = len(kernel_sizes) * num_filters
    bs, d = x_ref.shape

    x = x_ref[...].astype(jnp.float32)

    # ---- value-level im2col: lane-dense (B*S, k_max*D) slab ------------------
    # Column block j holds x shifted up by j rows; tail rows are explicit zeros
    # (they only feed positions that get masked before pooling anyway).
    cols = [x]
    for j in range(1, k_max):
        shifted = jnp.concatenate([x[j:, :], jnp.zeros((j, d), jnp.float32)], axis=0)
        cols.append(shifted)
    col = jnp.concatenate(cols, axis=1)                              # (bs, k_max*D)

    cw = w_ref[:, 0:n_feat]                                          # (k_max*D, nF)
    fw = w_ref[0:n_feat, n_feat:n_feat + output_dim]                 # (nF, OUT)
    cb = b_ref[:, 0:n_feat]                                          # (1, nF)
    fb = b_ref[:, n_feat:n_feat + output_dim]                        # (1, OUT)

    # ---- all conv branches as ONE (bs, 128) @ (128, nF) MXU matmul -----------
    conv = jnp.dot(col, cw, preferred_element_type=jnp.float32) + cb
    r = jnp.maximum(conv, 0.0)                                       # (bs, nF)

    # ---- mask positions t >= L_k per branch, then max + mean pooling ---------
    # Per-feature valid lengths built from iota + Python scalars (no captured
    # array constants).
    r3 = r.reshape(batch, seq, n_feat)                               # (B, S, nF)
    t_pos = jax.lax.broadcasted_iota(jnp.int32, (batch, seq, n_feat), 1)
    f_pos = jax.lax.broadcasted_iota(jnp.int32, (batch, seq, n_feat), 2)
    len_col = jnp.zeros((batch, seq, n_feat), jnp.int32)
    for i, k in enumerate(kernel_sizes):
        branch = (f_pos >= i * num_filters) & (f_pos < (i + 1) * num_filters)
        len_col = jnp.where(branch, seq - k + 1, len_col)
    r3 = jnp.where(t_pos < len_col, r3, 0.0)                         # ReLU >= 0 so max is safe

    f2 = jax.lax.broadcasted_iota(jnp.int32, (batch, n_feat), 1)
    inv_len = jnp.zeros((batch, n_feat), jnp.float32)
    for i, k in enumerate(kernel_sizes):
        branch = (f2 >= i * num_filters) & (f2 < (i + 1) * num_filters)
        inv_len = jnp.where(branch, 1.0 / (seq - k + 1), inv_len)

    feat = jnp.max(r3, axis=1) + jnp.sum(r3, axis=1) * inv_len       # (B, nF)

    # ---- final Linear ---------------------------------------------------------
    out = jnp.dot(feat, fw, preferred_element_type=jnp.float32) + fb
    out_ref[...] = out.astype(out_ref.dtype)


def pack_params(conv_ws, conv_bs, fc_w, fc_b,
                kernel_sizes=KERNEL_SIZES, num_filters=NUM_FILTERS,
                input_dim=D, output_dim=OUTPUT_DIM):
    """Pack PyTorch-layout weights ONCE into the kernel's fused layout (2 arrays)."""
    k_max = max(kernel_sizes)
    n_feat = len(kernel_sizes) * num_filters
    cols = []
    for w, k in zip(conv_ws, kernel_sizes):
        # (F, D, k) -> (k, D, F) -> (k*D, F); zero-pad unused taps to k_max*D rows.
        w_t = jnp.transpose(w, (2, 1, 0)).reshape(k * input_dim, num_filters)
        w_t = jnp.pad(w_t, ((0, (k_max - k) * input_dim), (0, 0)))
        cols.append(w_t)
    conv_w = jnp.concatenate(cols, axis=1)                            # (k_max*D, nF)
    fc_w_t = jnp.transpose(fc_w)                                      # (nF, OUT)
    fc_w_pad = jnp.pad(fc_w_t, ((0, k_max * input_dim - n_feat), (0, 0)))
    w_packed = jnp.concatenate([conv_w, fc_w_pad], axis=1).astype(jnp.float32)  # (128, 56)
    b_packed = jnp.concatenate(
        [jnp.concatenate(conv_bs, axis=0), fc_b], axis=0
    ).reshape(1, n_feat + output_dim).astype(jnp.float32)             # (1, 56)
    return w_packed, b_packed


def textcnn_forward(x, packed,
                    kernel_sizes=KERNEL_SIZES, num_filters=NUM_FILTERS,
                    output_dim=OUTPUT_DIM, batch_per_step=None):
    """x: (B, S, D); packed: output of pack_params (built once, reused per call)."""
    w_packed, b_packed = packed
    batch, seq, dim = x.shape
    if batch_per_step is None:
        batch_per_step = batch
    assert batch % batch_per_step == 0
    x2 = x.reshape(batch * seq, dim)        # contiguous reshape: free in XLA

    k_max = max(kernel_sizes)
    n_feat = len(kernel_sizes) * num_filters
    rows = batch_per_step * seq
    grid = (batch // batch_per_step,)

    flops = 2 * batch * seq * (k_max * dim) * n_feat + 2 * batch * n_feat * output_dim
    bytes_accessed = 4 * (x2.size + w_packed.size + b_packed.size + batch * output_dim)
    cost = pl.CostEstimate(flops=flops, transcendentals=0, bytes_accessed=bytes_accessed)

    kernel = functools.partial(textcnn_kernel, kernel_sizes, num_filters,
                               batch_per_step, seq, output_dim)
    return pl.pallas_call(
        kernel,
        out_shape=jax.ShapeDtypeStruct((batch, output_dim), x.dtype),
        grid=grid,
        in_specs=[
            pl.BlockSpec((rows, dim), lambda i: (i, 0)),
            pl.BlockSpec(w_packed.shape, lambda i: (0, 0)),   # weights stay VMEM-resident
            pl.BlockSpec(b_packed.shape, lambda i: (0, 0)),
        ],
        out_specs=pl.BlockSpec((batch_per_step, output_dim), lambda i: (i, 0)),
        compiler_params=pltpu.CompilerParams(dimension_semantics=("parallel",)),
        cost_estimate=cost,
    )(x2, w_packed, b_packed)


def ref_forward(x, conv_ws, conv_bs, fc_w, fc_b):
    """Pure-JAX reference mirroring the PyTorch forward (mask=None path)."""
    xt = jnp.transpose(x, (0, 2, 1))               # (B, D, S) == NCW
    f0, f1 = [], []
    for w, b in zip(conv_ws, conv_bs):
        out = jax.lax.conv_general_dilated(
            xt, w, window_strides=(1,), padding='VALID',
            dimension_numbers=('NCH', 'OIH', 'NCH'))
        out = out + b[None, :, None]
        r = jnp.maximum(out, 0.0)
        f0.append(jnp.max(r, axis=2))
        f1.append(jnp.mean(r, axis=2))
    feat = jnp.concatenate(f0, axis=1) + jnp.concatenate(f1, axis=1)
    return feat @ fc_w.T + fc_b[None, :]


if __name__ == "__main__":
    key = jax.random.PRNGKey(0)
    keys = jax.random.split(key, 3 + 2 * len(KERNEL_SIZES))

    x = jax.random.normal(keys[0], (B, S, D), jnp.float32)

    conv_ws, conv_bs = [], []
    for i, k in enumerate(KERNEL_SIZES):
        conv_ws.append(0.1 * jax.random.normal(
            keys[1 + 2 * i], (NUM_FILTERS, D, k), jnp.float32))
        conv_bs.append(0.1 * jax.random.normal(
            keys[2 + 2 * i], (NUM_FILTERS,), jnp.float32))

    fc_w = 0.1 * jax.random.normal(
        keys[1 + 2 * len(KERNEL_SIZES)],
        (OUTPUT_DIM, len(KERNEL_SIZES) * NUM_FILTERS), jnp.float32)
    fc_b = 0.1 * jax.random.normal(
        keys[2 + 2 * len(KERNEL_SIZES)], (OUTPUT_DIM,), jnp.float32)

    # Pack weights once, outside the per-forward path.
    packed = tuple(jax.block_until_ready(p)
                   for p in pack_params(conv_ws, conv_bs, fc_w, fc_b))

    out = jax.block_until_ready(textcnn_forward(x, packed))

    ref = jax.block_until_ready(ref_forward(x, conv_ws, conv_bs, fc_w, fc_b))
    assert out.shape == (B, OUTPUT_DIM)
    assert jnp.allclose(out, ref, atol=1e-4, rtol=1e-4), (out, ref)

    print("KERNEL_OK")
</pallas_src>

<mosaic_0001>
module attributes {stable_mosaic.version = 11 : i64} {
  func.func @textcnn_kernel(%arg0: i32, %arg1: memref<32x32xf32, #tpu.memory_space<vmem>>, %arg2: memref<128x56xf32, #tpu.memory_space<vmem>>, %arg3: memref<1x56xf32, #tpu.memory_space<vmem>>, %arg4: memref<2x8xf32, #tpu.memory_space<vmem>>) attributes {dimension_semantics = [#tpu.dimension_semantics<parallel>], iteration_bounds = array<i64: 1>, scalar_prefetch = 0 : i64, scratch_operands = 0 : i64, tpu.core_type = #tpu.core_type<tc>, window_params = [{transform_indices = @transform_0, window_bounds = array<i64: 32, 32>}, {pipeline_mode = #tpu.pipeline_mode<synchronous>, transform_indices = @transform_1, window_bounds = array<i64: 128, 56>}, {pipeline_mode = #tpu.pipeline_mode<synchronous>, transform_indices = @transform_2, window_bounds = array<i64: 1, 56>}, {transform_indices = @transform_3, window_bounds = array<i64: 2, 8>}]} {
    %c0 = arith.constant 0 : index
    %c0_0 = arith.constant 0 : index
    %0 = vector.load %arg1[%c0, %c0_0] : memref<32x32xf32, #tpu.memory_space<vmem>>, vector<32x32xf32>
    %1 = vector.extract_strided_slice %0 {offsets = [1, 0], sizes = [31, 32], strides = [1, 1]} : vector<32x32xf32> to vector<31x32xf32>
    %cst = arith.constant 0.000000e+00 : f32
    %2 = vector.broadcast %cst : f32 to vector<1x32xf32>
    %3 = tpu.concatenate %1, %2 in 0 : vector<31x32xf32>, vector<1x32xf32> -> vector<32x32xf32>
    %4 = vector.extract_strided_slice %0 {offsets = [2, 0], sizes = [30, 32], strides = [1, 1]} : vector<32x32xf32> to vector<30x32xf32>
    %cst_1 = arith.constant 0.000000e+00 : f32
    %5 = vector.broadcast %cst_1 : f32 to vector<2x32xf32>
    %6 = tpu.concatenate %4, %5 in 0 : vector<30x32xf32>, vector<2x32xf32> -> vector<32x32xf32>
    %7 = vector.extract_strided_slice %0 {offsets = [3, 0], sizes = [29, 32], strides = [1, 1]} : vector<32x32xf32> to vector<29x32xf32>
    %cst_2 = arith.constant 0.000000e+00 : f32
    %8 = vector.broadcast %cst_2 : f32 to vector<3x32xf32>
    %9 = tpu.concatenate %7, %8 in 0 : vector<29x32xf32>, vector<3x32xf32> -> vector<32x32xf32>
    %10 = tpu.concatenate %0, %3, %6, %9 in 1 : vector<32x32xf32>, vector<32x32xf32>, vector<32x32xf32>, vector<32x32xf32> -> vector<32x128xf32>
    %c0_3 = arith.constant 0 : index
    %c0_4 = arith.constant 0 : index
    %11 = vector.load %arg2[%c0_3, %c0_4] : memref<128x56xf32, #tpu.memory_space<vmem>>, vector<128x48xf32>
    %c0_5 = arith.constant 0 : index
    %c48 = arith.constant 48 : index
    %12 = vector.load %arg2[%c0_5, %c48] : memref<128x56xf32, #tpu.memory_space<vmem>>, vector<48x8xf32>
    %c0_6 = arith.constant 0 : index
    %c0_7 = arith.constant 0 : index
    %13 = vector.load %arg3[%c0_6, %c0_7] : memref<1x56xf32, #tpu.memory_space<vmem>>, vector<1x48xf32>
    %c0_8 = arith.constant 0 : index
    %c48_9 = arith.constant 48 : index
    %14 = vector.load %arg3[%c0_8, %c48_9] : memref<1x56xf32, #tpu.memory_space<vmem>>, vector<1x8xf32>
    %cst_10 = arith.constant dense<0.000000e+00> : vector<32x48xf32>
    %15 = tpu.matmul %10, %11, %cst_10 {dimension_numbers = #tpu.dot_dimension_numbers<[1], [0], [0], [1], [0, 0, 1, 1], [], []>} : vector<32x128xf32>, vector<128x48xf32>, vector<32x48xf32> -> vector<32x48xf32>
    %16 = vector.broadcast %13 : vector<1x48xf32> to vector<32x48xf32>
    %17 = arith.addf %15, %16 : vector<32x48xf32>
    %cst_11 = arith.constant 0.000000e+00 : f32
    %18 = vector.broadcast %cst_11 : f32 to vector<32x48xf32>
    %19 = arith.maximumf %17, %18 : vector<32x48xf32>
    %20 = vector.shape_cast %19 : vector<32x48xf32> to vector<2x16x48xf32>
    %21 = tpu.iota {dimensions = array<i32: 1>} : vector<2x16x48xi32>
    %22 = tpu.iota {dimensions = array<i32: 2>} : vector<2x16x48xi32>
    %c0_i32 = arith.constant 0 : i32
    %23 = vector.broadcast %c0_i32 : i32 to vector<2x16x48xi32>
    %c0_i32_12 = arith.constant 0 : i32
    %24 = vector.broadcast %c0_i32_12 : i32 to vector<2x16x48xi32>
    %25 = arith.cmpi sge, %22, %24 : vector<2x16x48xi32>
    %c16_i32 = arith.constant 16 : i32
    %26 = vector.broadcast %c16_i32 : i32 to vector<2x16x48xi32>
    %27 = arith.cmpi slt, %22, %26 : vector<2x16x48xi32>
    %28 = arith.andi %25, %27 : vector<2x16x48xi1>
    %c15_i32 = arith.constant 15 : i32
    %29 = vector.broadcast %c15_i32 : i32 to vector<2x16x48xi32>
    %30 = arith.select %28, %29, %23 : vector<2x16x48xi1>, vector<2x16x48xi32>
    %c16_i32_13 = arith.constant 16 : i32
    %31 = vector.broadcast %c16_i32_13 : i32 to vector<2x16x48xi32>
    %32 = arith.cmpi sge, %22, %31 : vector<2x16x48xi32>
    %c32_i32 = arith.constant 32 : i32
    %33 = vector.broadcast %c32_i32 : i32 to vector<2x16x48xi32>
    %34 = arith.cmpi slt, %22, %33 : vector<2x16x48xi32>
    %35 = arith.andi %32, %34 : vector<2x16x48xi1>
    %c14_i32 = arith.constant 14 : i32
    %36 = vector.broadcast %c14_i32 : i32 to vector<2x16x48xi32>
    %37 = arith.select %35, %36, %30 : vector<2x16x48xi1>, vector<2x16x48xi32>
    %c32_i32_14 = arith.constant 32 : i32
    %38 = vector.broadcast %c32_i32_14 : i32 to vector<2x16x48xi32>
    %39 = arith.cmpi sge, %22, %38 : vector<2x16x48xi32>
    %c48_i32 = arith.constant 48 : i32
    %40 = vector.broadcast %c48_i32 : i32 to vector<2x16x48xi32>
    %41 = arith.cmpi slt, %22, %40 : vector<2x16x48xi32>
    %42 = arith.andi %39, %41 : vector<2x16x48xi1>
    %c13_i32 = arith.constant 13 : i32
    %43 = vector.broadcast %c13_i32 : i32 to vector<2x16x48xi32>
    %44 = arith.select %42, %43, %37 : vector<2x16x48xi1>, vector<2x16x48xi32>
    %45 = arith.cmpi slt, %21, %44 : vector<2x16x48xi32>
    %cst_15 = arith.constant 0.000000e+00 : f32
    %46 = vector.broadcast %cst_15 : f32 to vector<2x16x48xf32>
    %47 = arith.select %45, %20, %46 : vector<2x16x48xi1>, vector<2x16x48xf32>
    %48 = tpu.iota {dimensions = array<i32: 1>} : vector<2x48xi32>
    %cst_16 = arith.constant 0.000000e+00 : f32
    %49 = vector.broadcast %cst_16 : f32 to vector<2x48xf32>
    %c0_i32_17 = arith.constant 0 : i32
    %50 = vector.broadcast %c0_i32_17 : i32 to vector<2x48xi32>
    %51 = arith.cmpi sge, %48, %50 : vector<2x48xi32>
    %c16_i32_18 = arith.constant 16 : i32
    %52 = vector.broadcast %c16_i32_18 : i32 to vector<2x48xi32>
    %53 = arith.cmpi slt, %48, %52 : vector<2x48xi32>
    %54 = arith.andi %51, %53 : vector<2x48xi1>
    %cst_19 = arith.constant 0.0666666701 : f32
    %55 = vector.broadcast %cst_19 : f32 to vector<2x48xf32>
    %56 = arith.select %54, %55, %49 : vector<2x48xi1>, vector<2x48xf32>
    %c16_i32_20 = arith.constant 16 : i32
    %57 = vector.broadcast %c16_i32_20 : i32 to vector<2x48xi32>
    %58 = arith.cmpi sge, %48, %57 : vector<2x48xi32>
    %c32_i32_21 = arith.constant 32 : i32
    %59 = vector.broadcast %c32_i32_21 : i32 to vector<2x48xi32>
    %60 = arith.cmpi slt, %48, %59 : vector<2x48xi32>
    %61 = arith.andi %58, %60 : vector<2x48xi1>
    %cst_22 = arith.constant 0.0714285746 : f32
    %62 = vector.broadcast %cst_22 : f32 to vector<2x48xf32>
    %63 = arith.select %61, %62, %56 : vector<2x48xi1>, vector<2x48xf32>
    %c32_i32_23 = arith.constant 32 : i32
    %64 = vector.broadcast %c32_i32_23 : i32 to vector<2x48xi32>
    %65 = arith.cmpi sge, %48, %64 : vector<2x48xi32>
    %c48_i32_24 = arith.constant 48 : i32
    %66 = vector.broadcast %c48_i32_24 : i32 to vector<2x48xi32>
    %67 = arith.cmpi slt, %48, %66 : vector<2x48xi32>
    %68 = arith.andi %65, %67 : vector<2x48xi1>
    %cst_25 = arith.constant 0.0769230798 : f32
    %69 = vector.broadcast %cst_25 : f32 to vector<2x48xf32>
    %70 = arith.select %68, %69, %63 : vector<2x48xi1>, vector<2x48xf32>
    %cst_26 = arith.constant dense<0xFF800000> : vector<2x48xf32>
    %71 = vector.multi_reduction <maximumf>, %47, %cst_26 [1] : vector<2x16x48xf32> to vector<2x48xf32>
    %cst_27 = arith.constant dense<0.000000e+00> : vector<2x48xf32>
    %72 = vector.multi_reduction <add>, %47, %cst_27 [1] : vector<2x16x48xf32> to vector<2x48xf32>
    %73 = arith.mulf %72, %70 : vector<2x48xf32>
    %74 = arith.addf %71, %73 : vector<2x48xf32>
    %cst_28 = arith.constant dense<0.000000e+00> : vector<2x8xf32>
    %75 = tpu.matmul %74, %12, %cst_28 {dimension_numbers = #tpu.dot_dimension_numbers<[1], [0], [0], [1], [0, 0, 1, 1], [], []>} : vector<2x48xf32>, vector<48x8xf32>, vector<2x8xf32> -> vector<2x8xf32>
    %76 = vector.broadcast %14 : vector<1x8xf32> to vector<2x8xf32>
    %77 = arith.addf %75, %76 : vector<2x8xf32>
    %c0_29 = arith.constant 0 : index
    %c0_30 = arith.constant 0 : index
    %78 = vector.load %arg4[%c0_29, %c0_30] : memref<2x8xf32, #tpu.memory_space<vmem>>, vector<2x8xf32>
    tpu.vector_store %arg4[%c0_29, %c0_30], %77 {strides = array<i32>} : memref<2x8xf32, #tpu.memory_space<vmem>>, vector<2x8xf32>,
    return
  }
  func.func @transform_0(%arg0: i32) -> (i32, i32) {
    %c0_i32 = arith.constant 0 : i32
    %c0_i32_0 = arith.constant 0 : i32
    return %arg0, %c0_i32 : i32, i32
  }
  func.func @transform_1(%arg0: i32) -> (i32, i32) {
    %c0_i32 = arith.constant 0 : i32
    %c0_i32_0 = arith.constant 0 : i32
    %c0_i32_1 = arith.constant 0 : i32
    return %c0_i32, %c0_i32_0 : i32, i32
  }
  func.func @transform_2(%arg0: i32) -> (i32, i32) {
    %c0_i32 = arith.constant 0 : i32
    %c0_i32_0 = arith.constant 0 : i32
    %c0_i32_1 = arith.constant 0 : i32
    return %c0_i32, %c0_i32_0 : i32, i32
  }
  func.func @transform_3(%arg0: i32) -> (i32, i32) {
    %c0_i32 = arith.constant 0 : i32
    %c0_i32_0 = arith.constant 0 : i32
    return %arg0, %c0_i32 : i32, i32
  }
}

</mosaic_0001>

<bundles_post_ra>
// kernel: tpu_custom_call.1
= control target key start
LH: loop header
LB: loop body
LE: loop exit
PB: predicated region body
PF: predicated region fallthrough
CT: control target
= control target key end

     0   :  { %vm23_vm0 = vcmask 1046528   ;;  %vm43_vm1 = vcmask 1044480   ;;  %vm33_vm2 = vcmask 1045504   ;;  %s607_s23 = smov 32   ;;  %s608_s28 = smov 96   ;;  %s794_s0 = inlined_call_operand.vmem [shape: f32[32,32], index: 0, kind: input, shape index: {}]   ;;  %s795_s1 = inlined_call_operand.vmem [shape: f32[128,56], index: 1, kind: input, shape index: {}]   ;;  %s796_s2 = inlined_call_operand.vmem [shape: f32[1,56], index: 2, kind: input, shape index: {}]   ;;  %s797_s3 = inlined_call_operand.hbm [shape: f32[2,8], index: 3, kind: output, shape index: {}]  }
   0x1   :  { %v639_v0 = vld [vmem:[%s794_s0] sm:$0xff]  ;;  %v644_v1 = vld [vmem:[%s794_s0 + $0x8] sm:$0xff]  ;;  %v649_v2 = vld [vmem:[%s794_s0 + $0x10] sm:$0xff] }
   0x2   :  { %v24_v3 = vrot.slane %v639_v0, 1  ;;  %v25_v4 = vrot.slane %v644_v1, 1  ;;  %v27_v5 = vrot.slane %v649_v2, 1  ;;  %v44_v6 = vrot.slane %v639_v0, 3  ;;  %v661_v10 = vld [vmem:[%s794_s0 + $0x18] sm:$0xff]  ;;  %v107_v23 = vld [vmem:[%s795_s1] sm:$0xff] }
   0x3   :  { %v45_v7 = vrot.slane %v644_v1, 3  ;;  %v47_v8 = vrot.slane %v649_v2, 3  ;;  %v34_v9 = vrot.slane %v639_v0, 2  ;;  %v35_v13 = vrot.slane %v644_v1, 2  ;;  %v108_v24 = vld [vmem:[%s795_s1 + $0x8] sm:$0xff]  ;;  %v109_v29 = vld [vmem:[%s795_s1 + $0x10] sm:$0xff] }
   0x4   :  { %v26_v11 = vsel %vm23_vm0, %v24_v3, %v25_v4  ;;  %v28_v12 = vsel %vm23_vm0, %v25_v4, %v27_v5  ;;  %v37_v14 = vrot.slane %v649_v2, 2  ;;  %v29_v18 = vrot.slane %v661_v10, 1  ;;  %v110_v30 = vld [vmem:[%s795_s1 + $0x18] sm:$0xff] }
   0x5   :  { %v538_v15 = vpack.i.bf16 %v28_v12, %v26_v11  ;;  %v46_v16 = vsel %vm43_vm1, %v44_v6, %v45_v7  ;;  %v48_v17 = vsel %vm43_vm1, %v45_v7, %v47_v8  ;;  %v36_v20 = vsel %vm33_vm2, %v34_v9, %v35_v13 }
   0x6   :  { %v548_v19 = vpack.i.bf16 %v48_v17, %v46_v16  ;;  %v38_v21 = vsel %vm33_vm2, %v35_v13, %v37_v14  ;;  %v39_v22 = vrot.slane %v661_v10, 2  ;;  %v30_v26 = vsel %vm23_vm0, %v27_v5, %v29_v18 }
   0x7   :  { %539 = vrot.lane.b32.xlu0 %v538_v15, %s607_s23  ;;  %v543_v25 = vpack.i.bf16 %v38_v21, %v36_v20  ;;  %v32_v27 = vsel %vm23_vm0, %v29_v18, 0.0  ;;  %v49_v28 = vrot.slane %v661_v10, 3  ;;  %v488_v36 = vpack.c.bf16 %v108_v24, %v107_v23 }
   0x8   :  { %549 = vrot.lane.b32.xlu1 %v548_v19, %s608_s28  ;;  %v553_v31 = vpack.i.bf16 %v32_v27, %v30_v26  ;;  %v40_v32 = vsel %vm33_vm2, %v37_v14, %v39_v22  ;;  %v42_v33 = vsel %vm33_vm2, %v39_v22, 0.0 }
   0x9   :  { %v50_v34 = vsel %vm43_vm1, %v47_v8, %v49_v28  ;;  %v52_v35 = vsel %vm43_vm1, %v49_v28, 0.0 }
   0xa   :  { %8 = vsyncpa [#allocation3], 0  ;;  %v492_v37 = vpack.c.bf16 %v110_v30, %v109_v29  ;;  %v111_v38 = vld [vmem:[%s795_s1 + $0x20] sm:$0xff]  ;;  %v112_v39 = vld [vmem:[%s795_s1 + $0x28] sm:$0xff]  ;;  %s609_s6 = smov 64   ;;  %v558_v40 = vpack.i.bf16 %v42_v33, %v40_v32  ;;  %489 = vmatprep.subr.bf16.mxu0 %v488_v36  ;;  %v563_v41 = vpack.i.bf16 %v52_v35, %v50_v34  ;;  %v568_v45 = vpack.i.bf16 %v108_v24, %v107_v23  ;;  %s610_s15 = smov 80  }
   0xb   :  { %544 = vrot.lane.b32.xlu0 %v543_v25, %s609_s6  ;;  %491 = vmatpush3.bf16.msra.mxu0 %v488_v36  ;;  %v496_v42 = vpack.c.bf16 %v112_v39, %v111_v38  ;;  %v113_v43 = vld [vmem:[%s795_s1 + $0x30] sm:$0xff]  ;;  %v114_v44 = vld [vmem:[%s795_s1 + $0x38] sm:$0xff]  ;;  %v573_v46 = vpack.i.bf16 %v110_v30, %v109_v29  ;;  %v115_v48 = vld [vmem:[%s795_s1 + $0x40] sm:$0xff]  ;;  %v578_v50 = vpack.i.bf16 %v112_v39, %v111_v38  ;;  %vm92_vm3 = vcmask 261120  }
   0xc   :  { %554 = vrot.lane.b32.xlu1 %v553_v31, %s607_s23  ;;  %493 = vmatprep.subr.bf16.mxu0 %v492_v37  ;;  %v500_v47 = vpack.c.bf16 %v114_v44, %v113_v43  ;;  %v116_v49 = vld [vmem:[%s795_s1 + $0x48] sm:$0xff]  ;;  %v117_v52 = vld [vmem:[%s795_s1 + $0x50] sm:$0xff]  ;;  %v118_v53 = vld [vmem:[%s795_s1 + $0x58] sm:$0xff]  ;;  %vm97_vm4 = vcmask 523264   ;;  %vm102_vm5 = vcmask 785408   ;;  %v611_v32 = vmov 0.0|0.0  }
   0xd   :  { %v504_v51 = vpack.c.bf16 %v116_v49, %v115_v48  ;;  %v508_v54 = vpack.c.bf16 %v118_v53, %v117_v52  ;;  %v119_v55 = vld [vmem:[%s795_s1 + $0x60] sm:$0xff]  ;;  %v120_v56 = vld [vmem:[%s795_s1 + $0x68] sm:$0xff]  ;;  %v121_v58 = vld [vmem:[%s795_s1 + $0x70] sm:$0xff]  ;;  %520 = vmatprep.subr.bf16.mxu1 %v611_v32  ;;  %vm612_vm6 = vmmov 0   ;;  %v614_v44 = vmov 0  }
   0xe   :  { %v512_v57 = vpack.c.bf16 %v120_v56, %v119_v55  ;;  %v122_v59 = vld [vmem:[%s795_s1 + $0x78] sm:$0xff]  ;;  %v406_v29 = vld [vmem:[%s796_s2] ss:$0 sm:$0xff]  ;;  %vm245_vm0 = vcmask 392192   ;;  %vm289_vm1 = vcmask 1041409   ;;  %s615_s2 = smov [#allocation2]  }
   0xf   :  { %559 = vrot.lane.b32.xlu0 %v558_v40, %s609_s6  ;;  %495 = vmatpush3.bf16.msra.mxu0 %v492_v37  ;;  %v516_v60 = vpack.c.bf16 %v122_v59, %v121_v58  ;;  %vm390_vm2 = vcmask 58368  }
  0x10   :  { %564 = vrot.lane.b32.xlu1 %v563_v41, %s608_s28  ;;  %497 = vmatprep.subr.bf16.mxu0 %v496_v42  ;;  %v613_v41 = vmov 0.0   ;;  %s398_s28 = sshll.u32 %s615_s2, 4  ;;  %s399_s28 = int_to_ptr.vmem [resolvable:$true] %s398_s28 }
  0x11   :  { %485 = vmatprep.mubr.msk.f32.mxu1 %vm612_vm6, %v613_v41  ;;  %s583_s29 = scalar_lea.vmem %s399_s28, 32  ;;  %p588_p1 = scmp.lt.s32.totalorder %s399_s28, %s399_s28 }
  0x12   :  { %p584_p0 = scmp.ne.s32.totalorder %s399_s28, %s583_s29  ;;  %p589_p2 = scmp.lt.s32.totalorder %s583_s29, %s583_s29 }
  0x13   :  { %569 = vrot.lane.b32.xlu0 %v568_v45, %s610_s15  ;;  %499 = vmatpush3.bf16.msra.mxu0 %v496_v42  ;;  %v219_v42 = vlaneseq }
  0x14   :  { %574 = vrot.lane.b32.xlu1 %v573_v46, %s610_s15  ;;  %501 = vmatprep.subr.bf16.mxu0 %v500_v47  ;;  %p590_p3 = por %p589_p2, %p588_p1 }
  0x15   :  { %v223_v43 = vand.u32 127, %v219_v42 }
  0x16   :  { %p591_p4 = pnand %p590_p3, %p584_p0 }
  0x17   :  { %579 = vrot.lane.b32.xlu0 %v578_v50, %s610_s15  ;;  %503 = vmatpush3.bf16.msra.mxu0 %v500_v47  ;;  %vm225_vm7 = vcmp.lt.s32.totalorder %v223_v43, 16  ;;  %vm228_vm8 = vcmp.ge.s32.totalorder %v223_v43, 16  ;;  %vm229_vm9 = vcmp.lt.s32.totalorder %v223_v43, 32  ;;  %vm232_vm11 = vcmp.ge.s32.totalorder %v223_v43, 32 }
  0x18   :  { %505 = vmatprep.subr.bf16.mxu0 %v504_v51  ;;  %315 = vrot.lane.b32.xlu1 %v406_v29, %s610_s15  ;;  %v227_v45 = vsel %vm225_vm7, 15, %v614_v44  ;;  %vm752_vm10 = vmand %vm228_vm8, %vm229_vm9  ;;  %vm233_vm12 = vcmp.lt.s32.totalorder %v223_v43, 48  ;;  %v220_v47 = vshrl.u32 %v219_v42, 7 }
  0x19   :  { %v231_v48 = vsel %vm752_vm10, 14, %v227_v45  ;;  %vm758_vm13 = vmand %vm232_vm11, %vm233_vm12 }
  0x1a   :  { %v221_v50 = vadd.s32 8, %v220_v47 }
  0x1b   :  { %507 = vmatpush3.bf16.msra.mxu0 %v504_v51  ;;  %v235_v51 = vsel %vm758_vm13, 13, %v231_v48 }
  0x1c   :  { %509 = vmatprep.subr.bf16.mxu0 %v508_v54  ;;  %vm237_vm14 = vcmp.lt.s32.totalorder %v221_v50, %v235_v51  ;;  %vm236_vm15 = vcmp.lt.s32.totalorder %v220_v47, %v235_v51 }
  0x1f   :  { %511 = vmatpush3.bf16.msra.mxu0 %v508_v54 }
  0x20   :  { %513 = vmatprep.subr.bf16.mxu0 %v512_v57 }
  0x23   :  { %515 = vmatpush3.bf16.msra.mxu0 %v512_v57 }
  0x24   :  { %517 = vmatprep.subr.bf16.mxu0 %v516_v60 }
  0x27   :  { %519 = vmatpush3.bf16.msra.mxu0 %v516_v60 }
  0x79   :  { %v540_v61 = vpop.permute.xlu0 %539 }
  0x7a   :  { %v550_v62 = vpop.permute.xlu1 %549  ;;  %v542_v63 = vunpack.i.h.bf16 %v540_v61  ;;  %v541_v3 = vunpack.i.l.bf16 %v540_v61 }
  0x7b   :  { %v552_v5 = vunpack.i.h.bf16 %v550_v62  ;;  %v551_v6 = vunpack.i.l.bf16 %v550_v62 }
  0x7c   :  { %v93_v13 = vsel %vm92_vm3, %v639_v0, %v541_v3  ;;  %v94_v14 = vsel %vm92_vm3, %v644_v1, %v542_v63 }
  0x7d   :  { %v545_v4 = vpop.permute.xlu0 %544 }
  0x7e   :  { %v547_v7 = vunpack.i.h.bf16 %v545_v4  ;;  %v546_v8 = vunpack.i.l.bf16 %v545_v4  ;;  %v555_v9 = vpop.permute.xlu1 %554 }
  0x7f   :  { %v557_v11 = vunpack.i.h.bf16 %v555_v9  ;;  %v556_v12 = vunpack.i.l.bf16 %v555_v9 }
  0x80   :  { %v98_v15 = vsel %vm97_vm4, %v93_v13, %v546_v8  ;;  %v99_v16 = vsel %vm97_vm4, %v94_v14, %v547_v7 }
  0x81   :  { %v560_v17 = vpop.permute.xlu0 %559  ;;  %v103_v18 = vsel %vm102_vm5, %v98_v15, %v551_v6  ;;  %v104_v19 = vsel %vm102_vm5, %v99_v16, %v552_v5  ;;  %v95_v0 = vsel %vm92_vm3, %v649_v2, %v556_v12  ;;  %v96_v1 = vsel %vm92_vm3, %v661_v10, %v557_v11 }
  0x82   :  { %v562_v20 = vunpack.i.h.bf16 %v560_v17  ;;  %v561_v21 = vunpack.i.l.bf16 %v560_v17  ;;  %v565_v22 = vpop.permute.xlu1 %564  ;;  %467 = vmatprep.mubr.f32.mxu0 %v103_v18  ;;  %v242_v17 = vsel %vm225_vm7, 0.06666667, %v613_v41 }
  0x83   :  { %v567_v23 = vunpack.i.h.bf16 %v565_v22  ;;  %v566_v24 = vunpack.i.l.bf16 %v565_v22  ;;  %468 = vmatmul.mubr.f32.vlgmr.msra.gmra.mrb[0].mxu0 %v104_v19 }
  0x84   :  { %v100_v25 = vsel %vm97_vm4, %v95_v0, %v561_v21  ;;  %v101_v26 = vsel %vm97_vm4, %v96_v1, %v562_v20 }
  0x85   :  { %v105_v27 = vsel %vm102_vm5, %v100_v25, %v566_v24  ;;  %v106_v28 = vsel %vm102_vm5, %v101_v26, %v567_v23  ;;  %v570_v2 = vpop.permute.xlu0 %569 }
  0x86   :  { %470 = vmatprep.mubr.f32.mxu0 %v105_v27  ;;  %v575_v30 = vpop.permute.xlu1 %574  ;;  %v572_v31 = vunpack.i.h.bf16 %v570_v2  ;;  %v571_v10 = vunpack.i.l.bf16 %v570_v2  ;;  %v243_v27 = vsel %vm752_vm10, 0.071428575, %v242_v17 }
  0x87   :  { %471 = vmatmul.mubr.f32.gmra.mrb[2].mxu0 %v106_v28  ;;  %v577_v33 = vunpack.i.h.bf16 %v575_v30  ;;  %v576_v34 = vunpack.i.l.bf16 %v575_v30 }
  0x88   :  { %v521_v35 = vpack.c.bf16 %v572_v31, %v571_v10 }
  0x89   :  { %v580_v36 = vpop.permute.xlu0 %579  ;;  %v524_v37 = vpack.c.bf16 %v577_v33, %v576_v34  ;;  %v244_v34 = vsel %vm758_vm13, 0.07692308, %v243_v27 }
  0x8a   :  { %522 = vmatpush3.bf16.msra.mxu1 %v521_v35  ;;  %v582_v38 = vunpack.i.h.bf16 %v580_v36  ;;  %v581_v39 = vunpack.i.l.bf16 %v580_v36  ;;  %v316_v50 = vpop.permute.xlu1 %315 }
  0x8b   :  { %523 = vmatprep.subr.bf16.mxu1 %v611_v32 }
  0x8c   :  { %v527_v40 = vpack.c.bf16 %v582_v38, %v581_v39 }
  0x8e   :  { %525 = vmatpush3.bf16.msra.mxu1 %v524_v37 }
  0x8f   :  { %526 = vmatprep.subr.bf16.mxu1 %v611_v32 }
  0x92   :  { %528 = vmatpush3.bf16.msra.mxu1 %v527_v40 }
 0x156   :  { %v469_v52 = vpop.f32.mrb[0].mxu0 }
 0x157   :  { %v202_v53 = vadd.f32 %v469_v52, %v406_v29  ;;  %v196_v54 = vpop.f32.mrb[1].mxu0 }
 0x158   :  { %v197_v55 = vadd.f32 %v406_v29, %v196_v54 }
 0x159   :  { %v216_v56 = vmax.f32 %v202_v53, 0.0 }
 0x15a   :  { %v215_v57 = vmax.f32 %v197_v55, 0.0  ;;  %v472_v58 = vpop.f32.mrb[2].mxu0 }
 0x15b   :  { %v212_v59 = vadd.f32 %v472_v58, %v406_v29  ;;  %v206_v60 = vpop.f32.mrb[3].mxu0  ;;  %v239_v61 = vsel %vm237_vm14, %v216_v56, 0.0 }
 0x15c   :  { %v207_v62 = vadd.f32 %v406_v29, %v206_v60  ;;  %v238_v63 = vsel %vm236_vm15, %v215_v57, 0.0  ;;  %v247_v3 = vsel %vm245_vm0, %v239_v61, -inf  ;;  %v265_v4 = vsel %vm245_vm0, %v239_v61, 0.0 }
 0x15d   :  { %v218_v5 = vmax.f32 %v212_v59, 0.0  ;;  %v246_v6 = vsel %vm245_vm0, %v238_v63, -inf  ;;  %v264_v7 = vsel %vm245_vm0, %v238_v63, 0.0 }
 0x15e   :  { %v217_v8 = vmax.f32 %v207_v62, 0.0  ;;  %v248_v9 = vmax.f32 %v246_v6, %v247_v3  ;;  %v266_v11 = vadd.f32 %v265_v4, %v264_v7 }
 0x15f   :  { %v241_v12 = vsel %vm237_vm14, %v218_v5, 0.0 }
 0x160   :  { %v240_v13 = vsel %vm236_vm15, %v217_v8, 0.0  ;;  %v249_v14 = vrot.slane %v248_v9, 4  ;;  %v256_v15 = vsel %vm245_vm0, %v241_v12, -inf  ;;  %v267_v16 = vrot.slane %v266_v11, 4 }
 0x161   :  { %v255_v18 = vsel %vm245_vm0, %v240_v13, -inf  ;;  %v273_v19 = vsel %vm245_vm0, %v240_v13, 0.0  ;;  %v274_v20 = vsel %vm245_vm0, %v241_v12, 0.0 }
 0x162   :  { %v250_v21 = vmax.f32 %v248_v9, %v249_v14  ;;  %v257_v22 = vmax.f32 %v255_v18, %v256_v15  ;;  %v268_v23 = vadd.f32 %v267_v16, %v266_v11  ;;  %v275_v24 = vadd.f32 %v274_v20, %v273_v19 }
 0x164   :  { %v251_v0 = vrot.slane %v250_v21, 2  ;;  %v258_v1 = vrot.slane %v257_v22, 4  ;;  %v269_v25 = vrot.slane %v268_v23, 2  ;;  %v276_v26 = vrot.slane %v275_v24, 4 }
 0x166   :  { %v252_v28 = vmax.f32 %v250_v21, %v251_v0  ;;  %v259_v29 = vmax.f32 %v257_v22, %v258_v1  ;;  %v270_v2 = vadd.f32 %v269_v25, %v268_v23  ;;  %v277_v30 = vadd.f32 %v276_v26, %v275_v24 }
 0x168   :  { %v253_v31 = vrot.slane %v252_v28, 1  ;;  %v260_v10 = vrot.slane %v259_v29, 2  ;;  %v271_v32 = vrot.slane %v270_v2, 1  ;;  %v278_v33 = vrot.slane %v277_v30, 2 }
 0x16a   :  { %v261_v35 = vmax.f32 %v259_v29, %v260_v10  ;;  %v272_v36 = vadd.f32 %v271_v32, %v270_v2  ;;  %v279_v37 = vadd.f32 %v278_v33, %v277_v30  ;;  %v254_v38 = vmax.f32 %v252_v28, %v253_v31 }
 0x16c   :  { %v262_v39 = vrot.slane %v261_v35, 1  ;;  %v280_v40 = vrot.slane %v279_v37, 1  ;;  %v282_v41 = vmul.f32 %v272_v36, %v244_v34 }
 0x16e   :  { %v281_v42 = vadd.f32 %v280_v40, %v279_v37  ;;  %v284_v43 = vadd.f32 %v282_v41, %v254_v38  ;;  %v263_v44 = vmax.f32 %v261_v35, %v262_v39 }
 0x170   :  { %v283_v45 = vmul.f32 %v281_v42, %v244_v34 }
 0x172   :  { %v285_v46 = vadd.f32 %v283_v45, %v263_v44 }
 0x174   :  { %v288_v47 = vrot.slane %v285_v46, 7 }
 0x176   :  { %v290_v48 = vsel %vm289_vm1, %v288_v47, %v284_v43 }
 0x177   :  { %486 = vmatmul.mubr.msk.f32.vlgmr.msra.gmra.mrb[0].mxu1 %vm245_vm0, %v290_v48 }
 0x24a   :  { %v386_v49 = vpop.f32.mrb[0].mxu1 }
 0x24b   :  { %v387_v51 = vadd.f32 %v386_v49, %v316_v50  ;;  %v487_v52 = vpop.f32.mrb[1].mxu1 }
 0x24d   :  { %391 = vst.msk [vmem:[#allocation2] sm:$0x3] %vm390_vm2, %v387_v51 }
 0x24e   :  { %594 = shalt.err (!%p591_p4)
}
 0x24f   :  { %s595_s5 = scalar_lea.hbm %s797_s3, 32 }
 0x250   :  { %p596_p5 = scmp.ne.s32.totalorder %s797_s3, %s595_s5  ;;  %p599_p6 = scmp.lt.u32.totalorder %s595_s5, %s797_s3 }
 0x252   :  { %p601_p7 = pnand %p599_p6, %p596_p5 }
 0x254   :  { %604 = shalt.err (!%p601_p7)
}
 0x255   :  { %401 = dma.vmem_to_hbm [thread:$0]  %s399_s28, 32, %s797_s3, [#allocation3]  }
 0x256   :  { %605 = dma.done.wait [#allocation3], 32  }
 0x257   :  { %606 = vsyncadd [#allocation3], 4294967264 }
 0x258   :  { %405 = vsyncpa [#allocation3], 1 }

</bundles_post_ra>
